<compile_context>
chip_gen: v6e
topology: v6e:2x2x1
jax: 0.10.0
libtpu: 0.0.40
codegen_flags: <defaults>
</compile_context>

<pallas_src>
import functools

import jax
import jax.numpy as jnp
from jax import lax
from jax.experimental import pallas as pl
from jax.experimental.pallas import tpu as pltpu


# ----------------------------- Pallas kernel ------------------------------- #
def _cbr_kernel(x_ref, w_ref, b_ref, w1_ref, w2_ref, scale_ref, shift_ref, o_ref,
                *, use_se, H, W, HWp, B_blk):
    # x_ref:     (B_blk, Cin, P)   zero-padded images, spatially flattened, bf16
    # w_ref:     (Cout, 9*Cin)     conv weight, taps stacked along K, bf16
    # b_ref:     (Cout, 1)         conv bias, f32
    # w1_ref:    (Cout, Cr)        SE fc1 weight^T, f32
    # w2_ref:    (Cout, Cr)        SE fc2 weight (PyTorch (out,in) layout), f32
    # scale_ref: (Cout, 1)         BN scale = gamma / sqrt(var + eps), f32
    # shift_ref: (Cout, 1)         BN shift = beta - mean * scale, f32
    # o_ref:     (B_blk, Cout, HWp) lane-dense (128-aligned) output slabs, bf16
    Wp = W + 2
    HWw = H * Wp

    # Build the 9 lane-shifted conv taps for every image in the block and fuse the
    # 3x3 conv into a single (Cout, 9*Cin) @ (9*Cin, B_blk*HWp) bf16 MXU matmul.
    tap_blocks = []
    for j in range(B_blk):
        xj = x_ref[j]                                           # (Cin, P) bf16
        slices = []
        for kh in range(3):
            for kw in range(3):
                off = kh * Wp + kw
                slices.append(xj[:, off:off + HWp])             # (Cin, HWp)
        tap_blocks.append(jnp.concatenate(slices, axis=0))      # (9*Cin, HWp)
    taps = tap_blocks[0] if B_blk == 1 else jnp.concatenate(tap_blocks, axis=1)

    z = jnp.dot(w_ref[...], taps, preferred_element_type=jnp.float32)
    z = z + b_ref[...]                       # raw conv output (pre-BN), f32, lane-dense

    scale = scale_ref[...]                   # (Cout, 1)
    shift = shift_ref[...]                   # (Cout, 1)

    if use_se:
        # SE global-average-pool weights generated in-kernel: 1/(H*W) on the valid
        # spatial columns of a per-image slab, 0 on width-pad and lane-pad columns.
        col = lax.broadcasted_iota(jnp.int32, (1, HWp), 1)
        valid = jnp.logical_and((col % Wp) < W, col < HWw)
        pool = jnp.where(valid, jnp.float32(1.0 / (H * W)), jnp.float32(0.0))

    for j in range(B_blk):
        zj = z[:, j * HWp:(j + 1) * HWp]                        # (Cout, HWp)
        if use_se:
            pooled = jnp.sum(zj * pool, axis=-1, keepdims=True)             # (Cout, 1)
            # M=1 SE matmuls stay on the VPU (broadcast-mul + tiny XLU reductions);
            # they are a pathological MXU shape.
            t1 = w1_ref[...] * pooled                                       # (Cout, Cr)
            hid = jnp.maximum(jnp.sum(t1, axis=0, keepdims=True), 0.0)      # (1, Cr)
            t2 = w2_ref[...] * hid                                          # (Cout, Cr)
            s = jax.nn.sigmoid(jnp.sum(t2, axis=-1, keepdims=True))         # (Cout, 1)
            gain = s * scale                 # fold BN scale into the per-channel SE gain
        else:
            gain = scale
        yj = jnp.clip(zj * gain + shift, 0.0, 6.0)              # BN affine + ReLU6, f32
        o_ref[j] = yj.astype(o_ref.dtype)


# ------------------------------ glue (JAX) --------------------------------- #
def _pick_b_blk(B, Cin, Cout, P, HWp):
    """Images per grid step: widen the lane dim to amortize the ~0.35us per-step
    overhead, keep >= 2 grid steps (v7x's two TensorCores / DMA pipelining), and
    stay well inside a 64 MiB/TC (v7x) VMEM budget."""
    if B <= 1:
        return 1
    want = max(1, 2048 // HWp)          # aim for >= ~2048 output lanes per step
    best = 1
    for cand in range(1, B // 2 + 1):
        if B % cand != 0:
            continue
        step_bytes = cand * (2 * Cin * P * 2 + 2 * Cout * HWp * 2
                             + HWp * (9 * Cin * 2 + 2 * Cout * 4))
        if step_bytes > 16 * 1024 * 1024:
            break
        best = cand
        if cand >= want:
            break
    return best


def cbr_block_forward(x_nchw, params, *, use_se=True, out_dtype=jnp.bfloat16,
                      b_blk=None, return_padded_layout=False):
    """Pallas implementation of CBRBlock.forward (eval-mode BN). NCHW in.

    By default returns NCHW (module semantics). Fused consumers should pass
    return_padded_layout=True to take the lane-padded (B, Cout, HWp) layout and
    skip the extra HBM strip pass (valid columns: c < H*(W+2) and (c % (W+2)) < W).
    """
    B, Cin, H, W = x_nchw.shape
    Wp = W + 2
    HWw = H * Wp
    HWp = ((HWw + 127) // 128) * 128
    eps = 1e-5

    bn_scale = (params["bn_gamma"] / jnp.sqrt(params["bn_var"] + eps)).astype(jnp.float32)
    bn_shift = (params["bn_beta"] - params["bn_mean"] * bn_scale).astype(jnp.float32)

    w_conv = params["conv_w"].astype(jnp.float32)                        # (Cout,Cin,3,3)
    Cout = w_conv.shape[0]
    # Stack taps along K: column index = (kh*3 + kw)*Cin + cin  (matches in-kernel concat).
    w_fused = jnp.transpose(w_conv, (0, 2, 3, 1)).reshape(Cout, 9 * Cin).astype(jnp.bfloat16)
    b_col = params["conv_b"].astype(jnp.float32).reshape(Cout, 1)
    scale_col = bn_scale.reshape(Cout, 1)
    shift_col = bn_shift.reshape(Cout, 1)

    if use_se:
        w1c = params["se_w1"].astype(jnp.float32).T                      # (Cout, Cr)
        w2k = params["se_w2"].astype(jnp.float32)                        # (Cout, Cr)
    else:
        w1c = jnp.zeros((Cout, 1), jnp.float32)
        w2k = jnp.zeros((Cout, 1), jnp.float32)
    Cr = w1c.shape[1]

    # Single bf16 pad pass: cast first, then one jnp.pad that adds the 1-pixel conv
    # halo plus enough extra bottom rows that every in-kernel tap slice
    # [off, off + HWp) stays in bounds.
    max_off = 2 * Wp + 2
    rows = max(H + 2, -(-(max_off + HWp) // Wp))
    bot = rows - (H + 1)
    P = rows * Wp
    x_flat = jnp.pad(x_nchw.astype(jnp.bfloat16),
                     ((0, 0), (0, 0), (1, bot), (1, 1))).reshape(B, Cin, P)

    if b_blk is None:
        b_blk = _pick_b_blk(B, Cin, Cout, P, HWp)
    assert B % b_blk == 0, (B, b_blk)
    G = B // b_blk

    # VMEM budget derived from the per-step footprint (double-buffered bf16 in/out
    # tiles + bf16 taps + f32 z/y intermediates) so it also fits v7x's 64 MiB/TC.
    step_bytes = b_blk * (2 * Cin * P * 2 + 2 * Cout * HWp * 2
                          + HWp * (9 * Cin * 2 + 2 * Cout * 4))
    vmem_limit = int(min(48 << 20, max(16 << 20, 8 * step_bytes)))

    kernel = functools.partial(_cbr_kernel, use_se=use_se, H=H, W=W,
                               HWp=HWp, B_blk=b_blk)

    out_pad = pl.pallas_call(
        kernel,
        out_shape=jax.ShapeDtypeStruct((B, Cout, HWp), out_dtype),
        grid_spec=pltpu.PrefetchScalarGridSpec(
            num_scalar_prefetch=0,
            grid=(G,),
            in_specs=[
                pl.BlockSpec((b_blk, Cin, P), lambda g: (g, 0, 0)),     # x (bf16)
                pl.BlockSpec((Cout, 9 * Cin), lambda g: (0, 0)),        # fused conv W (bf16)
                pl.BlockSpec((Cout, 1), lambda g: (0, 0)),              # conv bias
                pl.BlockSpec((Cout, Cr), lambda g: (0, 0)),             # SE fc1^T
                pl.BlockSpec((Cout, Cr), lambda g: (0, 0)),             # SE fc2
                pl.BlockSpec((Cout, 1), lambda g: (0, 0)),              # BN scale
                pl.BlockSpec((Cout, 1), lambda g: (0, 0)),              # BN shift
            ],
            out_specs=pl.BlockSpec((b_blk, Cout, HWp), lambda g: (g, 0, 0)),
        ),
        compiler_params=pltpu.CompilerParams(
            dimension_semantics=("parallel",),
            vmem_limit_bytes=vmem_limit),
    )(x_flat, w_fused, b_col, w1c, w2k, scale_col, shift_col)

    if return_padded_layout:
        return out_pad
    # NCHW strip (an extra HBM pass) -- kept only for standalone use / validation.
    return out_pad[:, :, :HWw].reshape(B, Cout, H, Wp)[:, :, :, :W]


# --------------------------- pure-JAX reference ----------------------------- #
def cbr_block_reference(x_nchw, params, *, use_se=True):
    eps = 1e-5
    y = lax.conv_general_dilated(
        x_nchw.astype(jnp.float32), params["conv_w"],
        window_strides=(1, 1), padding=((1, 1), (1, 1)),
        dimension_numbers=("NCHW", "OIHW", "NCHW"),
    ) + params["conv_b"][None, :, None, None]
    if use_se:
        pooled = y.mean(axis=(2, 3))                              # (B, Cout)
        h = jnp.maximum(pooled @ params["se_w1"].T, 0.0)
        s = jax.nn.sigmoid(h @ params["se_w2"].T)
        y = y * s[:, :, None, None]
    scale = params["bn_gamma"] / jnp.sqrt(params["bn_var"] + eps)
    shift = params["bn_beta"] - params["bn_mean"] * scale
    y = y * scale[None, :, None, None] + shift[None, :, None, None]
    return jnp.clip(y, 0.0, 6.0)


# ---------------------------------- main ------------------------------------ #
if __name__ == "__main__":
    key = jax.random.PRNGKey(0)
    B, Cin, Cout, H, W = 2, 4, 8, 16, 16
    reduction = 4
    Cr = Cout // reduction

    ks = jax.random.split(key, 9)
    params = {
        "conv_w": 0.2 * jax.random.normal(ks[0], (Cout, Cin, 3, 3), jnp.float32),
        "conv_b": 0.1 * jax.random.normal(ks[1], (Cout,), jnp.float32),
        "bn_gamma": 1.0 + 0.1 * jax.random.normal(ks[2], (Cout,), jnp.float32),
        "bn_beta": 0.1 * jax.random.normal(ks[3], (Cout,), jnp.float32),
        "bn_mean": 0.05 * jax.random.normal(ks[4], (Cout,), jnp.float32),
        "bn_var": jax.random.uniform(ks[5], (Cout,), jnp.float32, 0.5, 1.5),
        "se_w1": 0.3 * jax.random.normal(ks[6], (Cr, Cout), jnp.float32),
        "se_w2": 0.3 * jax.random.normal(ks[7], (Cout, Cr), jnp.float32),
    }
    x = jax.random.normal(ks[8], (B, Cin, H, W), jnp.float32)

    out = cbr_block_forward(x, params, use_se=True)
    jax.block_until_ready(out)

    # Reference evaluated on the bf16-rounded input the kernel actually consumes;
    # remaining diff is dominated by the bf16 weight/output casts (ReLU6 range -> small).
    xq = x.astype(jnp.bfloat16).astype(jnp.float32)
    ref = cbr_block_reference(xq, params, use_se=True)
    err = jnp.max(jnp.abs(out.astype(jnp.float32) - ref))
    assert out.shape == (B, Cout, H, W)
    assert err < 5e-2, f"SE path mismatch vs reference: {err}"

    out2 = cbr_block_forward(x, params, use_se=False)
    jax.block_until_ready(out2)
    ref2 = cbr_block_reference(xq, params, use_se=False)
    err2 = jnp.max(jnp.abs(out2.astype(jnp.float32) - ref2))
    assert err2 < 5e-2, f"no-SE path mismatch vs reference: {err2}"

    print("KERNEL_OK")
</pallas_src>

<mosaic_0001>
module attributes {stable_mosaic.version = 11 : i64} {
  func.func @_cbr_kernel(%arg0: i32, %arg1: memref<1x4x432xbf16, #tpu.memory_space<vmem>>, %arg2: memref<8x36xbf16, #tpu.memory_space<vmem>>, %arg3: memref<8x1xf32, #tpu.memory_space<vmem>>, %arg4: memref<8x2xf32, #tpu.memory_space<vmem>>, %arg5: memref<8x2xf32, #tpu.memory_space<vmem>>, %arg6: memref<8x1xf32, #tpu.memory_space<vmem>>, %arg7: memref<8x1xf32, #tpu.memory_space<vmem>>, %arg8: memref<1x8x384xbf16, #tpu.memory_space<vmem>>) attributes {dimension_semantics = [#tpu.dimension_semantics<parallel>], iteration_bounds = array<i64: 2>, scalar_prefetch = 0 : i64, scratch_operands = 0 : i64, tpu.core_type = #tpu.core_type<tc>, window_params = [{transform_indices = @transform_0, window_bounds = array<i64: 1, 4, 432>}, {pipeline_mode = #tpu.pipeline_mode<synchronous>, transform_indices = @transform_1, window_bounds = array<i64: 8, 36>}, {pipeline_mode = #tpu.pipeline_mode<synchronous>, transform_indices = @transform_2, window_bounds = array<i64: 8, 1>}, {pipeline_mode = #tpu.pipeline_mode<synchronous>, transform_indices = @transform_3, window_bounds = array<i64: 8, 2>}, {pipeline_mode = #tpu.pipeline_mode<synchronous>, transform_indices = @transform_4, window_bounds = array<i64: 8, 2>}, {pipeline_mode = #tpu.pipeline_mode<synchronous>, transform_indices = @transform_5, window_bounds = array<i64: 8, 1>}, {pipeline_mode = #tpu.pipeline_mode<synchronous>, transform_indices = @transform_6, window_bounds = array<i64: 8, 1>}, {transform_indices = @transform_7, window_bounds = array<i64: 1, 8, 384>}]} {
    %c0 = arith.constant 0 : index
    %c0_0 = arith.constant 0 : index
    %c0_1 = arith.constant 0 : index
    %0 = vector.load %arg1[%c0, %c0_0, %c0_1] : memref<1x4x432xbf16, #tpu.memory_space<vmem>>, vector<1x4x432xbf16>
    %1 = vector.shape_cast %0 : vector<1x4x432xbf16> to vector<4x432xbf16>
    %2 = vector.extract_strided_slice %1 {offsets = [0, 0], sizes = [4, 384], strides = [1, 1]} : vector<4x432xbf16> to vector<4x384xbf16>
    %3 = vector.extract_strided_slice %1 {offsets = [0, 1], sizes = [4, 384], strides = [1, 1]} : vector<4x432xbf16> to vector<4x384xbf16>
    %4 = vector.extract_strided_slice %1 {offsets = [0, 2], sizes = [4, 384], strides = [1, 1]} : vector<4x432xbf16> to vector<4x384xbf16>
    %5 = vector.extract_strided_slice %1 {offsets = [0, 18], sizes = [4, 384], strides = [1, 1]} : vector<4x432xbf16> to vector<4x384xbf16>
    %6 = vector.extract_strided_slice %1 {offsets = [0, 19], sizes = [4, 384], strides = [1, 1]} : vector<4x432xbf16> to vector<4x384xbf16>
    %7 = vector.extract_strided_slice %1 {offsets = [0, 20], sizes = [4, 384], strides = [1, 1]} : vector<4x432xbf16> to vector<4x384xbf16>
    %8 = vector.extract_strided_slice %1 {offsets = [0, 36], sizes = [4, 384], strides = [1, 1]} : vector<4x432xbf16> to vector<4x384xbf16>
    %9 = vector.extract_strided_slice %1 {offsets = [0, 37], sizes = [4, 384], strides = [1, 1]} : vector<4x432xbf16> to vector<4x384xbf16>
    %10 = vector.extract_strided_slice %1 {offsets = [0, 38], sizes = [4, 384], strides = [1, 1]} : vector<4x432xbf16> to vector<4x384xbf16>
    %11 = tpu.concatenate %2, %3, %4, %5, %6, %7, %8, %9, %10 in 0 : vector<4x384xbf16>, vector<4x384xbf16>, vector<4x384xbf16>, vector<4x384xbf16>, vector<4x384xbf16>, vector<4x384xbf16>, vector<4x384xbf16>, vector<4x384xbf16>, vector<4x384xbf16> -> vector<36x384xbf16>
    %c0_2 = arith.constant 0 : index
    %c0_3 = arith.constant 0 : index
    %12 = vector.load %arg2[%c0_2, %c0_3] : memref<8x36xbf16, #tpu.memory_space<vmem>>, vector<8x36xbf16>
    %cst = arith.constant dense<0.000000e+00> : vector<8x384xf32>
    %13 = tpu.matmul %12, %11, %cst {dimension_numbers = #tpu.dot_dimension_numbers<[1], [0], [0], [1], [0, 0, 1, 1], [], []>} : vector<8x36xbf16>, vector<36x384xbf16>, vector<8x384xf32> -> vector<8x384xf32>
    %c0_4 = arith.constant 0 : index
    %c0_5 = arith.constant 0 : index
    %14 = vector.load %arg3[%c0_4, %c0_5] : memref<8x1xf32, #tpu.memory_space<vmem>>, vector<8x1xf32>
    %15 = vector.broadcast %14 : vector<8x1xf32> to vector<8x384xf32>
    %16 = arith.addf %13, %15 : vector<8x384xf32>
    %c0_6 = arith.constant 0 : index
    %c0_7 = arith.constant 0 : index
    %17 = vector.load %arg6[%c0_6, %c0_7] : memref<8x1xf32, #tpu.memory_space<vmem>>, vector<8x1xf32>
    %c0_8 = arith.constant 0 : index
    %c0_9 = arith.constant 0 : index
    %18 = vector.load %arg7[%c0_8, %c0_9] : memref<8x1xf32, #tpu.memory_space<vmem>>, vector<8x1xf32>
    %19 = tpu.iota {dimensions = array<i32: 1>} : vector<1x384xi32>
    %c18_i32 = arith.constant 18 : i32
    %c0_i32 = arith.constant 0 : i32
    %20 = arith.cmpi eq, %c18_i32, %c0_i32 : i32
    %c1_i32 = arith.constant 1 : i32
    %21 = arith.select %20, %c1_i32, %c18_i32 : i32
    %22 = vector.broadcast %21 : i32 to vector<1x384xi32>
    %23 = arith.remsi %19, %22 : vector<1x384xi32>
    %c0_i32_10 = arith.constant 0 : i32
    %24 = vector.broadcast %c0_i32_10 : i32 to vector<1x384xi32>
    %25 = arith.cmpi ne, %23, %24 : vector<1x384xi32>
    %c0_i32_11 = arith.constant 0 : i32
    %26 = vector.broadcast %c0_i32_11 : i32 to vector<1x384xi32>
    %27 = arith.cmpi slt, %23, %26 : vector<1x384xi32>
    %c0_i32_12 = arith.constant 0 : i32
    %28 = arith.cmpi slt, %21, %c0_i32_12 : i32
    %29 = vector.broadcast %28 : i1 to vector<1x384xi1>
    %30 = vector.broadcast %29 : vector<1x384xi1> to vector<1x384xi1>
    %31 = arith.xori %27, %30 : vector<1x384xi1>
    %32 = arith.andi %31, %25 : vector<1x384xi1>
    %33 = vector.broadcast %21 : i32 to vector<1x384xi32>
    %34 = arith.addi %23, %33 : vector<1x384xi32>
    %35 = arith.select %32, %34, %23 : vector<1x384xi1>, vector<1x384xi32>
    %c16_i32 = arith.constant 16 : i32
    %36 = vector.broadcast %c16_i32 : i32 to vector<1x384xi32>
    %37 = arith.cmpi slt, %35, %36 : vector<1x384xi32>
    %c288_i32 = arith.constant 288 : i32
    %38 = vector.broadcast %c288_i32 : i32 to vector<1x384xi32>
    %39 = arith.cmpi slt, %19, %38 : vector<1x384xi32>
    %40 = arith.andi %37, %39 : vector<1x384xi1>
    %cst_13 = arith.constant 3.906250e-03 : f32
    %cst_14 = arith.constant 0.000000e+00 : f32
    %41 = vector.broadcast %cst_13 : f32 to vector<1x384xf32>
    %42 = vector.broadcast %cst_14 : f32 to vector<1x384xf32>
    %43 = arith.select %40, %41, %42 : vector<1x384xi1>, vector<1x384xf32>
    %44 = vector.broadcast %43 : vector<1x384xf32> to vector<8x384xf32>
    %45 = arith.mulf %16, %44 : vector<8x384xf32>
    %cst_15 = arith.constant dense<0.000000e+00> : vector<8xf32>
    %46 = vector.multi_reduction <add>, %45, %cst_15 [1] : vector<8x384xf32> to vector<8xf32>
    %47 = vector.shape_cast %46 : vector<8xf32> to vector<8x1xf32>
    %c0_16 = arith.constant 0 : index
    %c0_17 = arith.constant 0 : index
    %48 = vector.load %arg4[%c0_16, %c0_17] : memref<8x2xf32, #tpu.memory_space<vmem>>, vector<8x2xf32>
    %49 = vector.broadcast %47 : vector<8x1xf32> to vector<8x2xf32>
    %50 = arith.mulf %48, %49 : vector<8x2xf32>
    %cst_18 = arith.constant dense<0.000000e+00> : vector<2xf32>
    %51 = vector.multi_reduction <add>, %50, %cst_18 [0] : vector<8x2xf32> to vector<2xf32>
    %52 = vector.shape_cast %51 : vector<2xf32> to vector<1x2xf32>
    %cst_19 = arith.constant 0.000000e+00 : f32
    %53 = vector.broadcast %cst_19 : f32 to vector<1x2xf32>
    %54 = arith.maximumf %52, %53 : vector<1x2xf32>
    %c0_20 = arith.constant 0 : index
    %c0_21 = arith.constant 0 : index
    %55 = vector.load %arg5[%c0_20, %c0_21] : memref<8x2xf32, #tpu.memory_space<vmem>>, vector<8x2xf32>
    %56 = vector.broadcast %54 : vector<1x2xf32> to vector<8x2xf32>
    %57 = arith.mulf %55, %56 : vector<8x2xf32>
    %cst_22 = arith.constant dense<0.000000e+00> : vector<8xf32>
    %58 = vector.multi_reduction <add>, %57, %cst_22 [1] : vector<8x2xf32> to vector<8xf32>
    %59 = vector.shape_cast %58 : vector<8xf32> to vector<8x1xf32>
    %60 = arith.negf %59 : vector<8x1xf32>
    %61 = math.exp %60 : vector<8x1xf32>
    %cst_23 = arith.constant 1.000000e+00 : f32
    %62 = vector.broadcast %cst_23 : f32 to vector<8x1xf32>
    %63 = arith.addf %62, %61 : vector<8x1xf32>
    %64 = arith.divf %62, %63 : vector<8x1xf32>
    %65 = arith.mulf %64, %17 : vector<8x1xf32>
    %66 = vector.broadcast %65 : vector<8x1xf32> to vector<8x384xf32>
    %67 = arith.mulf %16, %66 : vector<8x384xf32>
    %68 = vector.broadcast %18 : vector<8x1xf32> to vector<8x384xf32>
    %69 = arith.addf %67, %68 : vector<8x384xf32>
    %cst_24 = arith.constant 0.000000e+00 : f32
    %cst_25 = arith.constant 6.000000e+00 : f32
    %70 = vector.broadcast %cst_24 : f32 to vector<8x384xf32>
    %71 = arith.maximumf %70, %69 : vector<8x384xf32>
    %72 = vector.broadcast %cst_25 : f32 to vector<8x384xf32>
    %73 = arith.minimumf %72, %71 : vector<8x384xf32>
    %74 = arith.truncf %73 : vector<8x384xf32> to vector<8x384xbf16>
    %c0_26 = arith.constant 0 : index
    %c0_27 = arith.constant 0 : index
    %c0_28 = arith.constant 0 : index
    %75 = vector.load %arg8[%c0_26, %c0_27, %c0_28] : memref<1x8x384xbf16, #tpu.memory_space<vmem>>, vector<1x8x384xbf16>
    %76 = vector.shape_cast %75 : vector<1x8x384xbf16> to vector<8x384xbf16>
    %77 = vector.shape_cast %74 : vector<8x384xbf16> to vector<1x8x384xbf16>
    tpu.vector_store %arg8[%c0_26, %c0_27, %c0_28], %77 {strides = array<i32>} : memref<1x8x384xbf16, #tpu.memory_space<vmem>>, vector<1x8x384xbf16>,
    return
  }
  func.func @transform_0(%arg0: i32) -> (i32, i32, i32) {
    %c0_i32 = arith.constant 0 : i32
    %c0_i32_0 = arith.constant 0 : i32
    %c0_i32_1 = arith.constant 0 : i32
    return %arg0, %c0_i32, %c0_i32_0 : i32, i32, i32
  }
  func.func @transform_1(%arg0: i32) -> (i32, i32) {
    %c0_i32 = arith.constant 0 : i32
    %c0_i32_0 = arith.constant 0 : i32
    %c0_i32_1 = arith.constant 0 : i32
    return %c0_i32, %c0_i32_0 : i32, i32
  }
  func.func @transform_2(%arg0: i32) -> (i32, i32) {
    %c0_i32 = arith.constant 0 : i32
    %c0_i32_0 = arith.constant 0 : i32
    %c0_i32_1 = arith.constant 0 : i32
    return %c0_i32, %c0_i32_0 : i32, i32
  }
  func.func @transform_3(%arg0: i32) -> (i32, i32) {
    %c0_i32 = arith.constant 0 : i32
    %c0_i32_0 = arith.constant 0 : i32
    %c0_i32_1 = arith.constant 0 : i32
    return %c0_i32, %c0_i32_0 : i32, i32
  }
  func.func @transform_4(%arg0: i32) -> (i32, i32) {
    %c0_i32 = arith.constant 0 : i32
    %c0_i32_0 = arith.constant 0 : i32
    %c0_i32_1 = arith.constant 0 : i32
    return %c0_i32, %c0_i32_0 : i32, i32
  }
  func.func @transform_5(%arg0: i32) -> (i32, i32) {
    %c0_i32 = arith.constant 0 : i32
    %c0_i32_0 = arith.constant 0 : i32
    %c0_i32_1 = arith.constant 0 : i32
    return %c0_i32, %c0_i32_0 : i32, i32
  }
  func.func @transform_6(%arg0: i32) -> (i32, i32) {
    %c0_i32 = arith.constant 0 : i32
    %c0_i32_0 = arith.constant 0 : i32
    %c0_i32_1 = arith.constant 0 : i32
    return %c0_i32, %c0_i32_0 : i32, i32
  }
  func.func @transform_7(%arg0: i32) -> (i32, i32, i32) {
    %c0_i32 = arith.constant 0 : i32
    %c0_i32_0 = arith.constant 0 : i32
    %c0_i32_1 = arith.constant 0 : i32
    return %arg0, %c0_i32, %c0_i32_0 : i32, i32, i32
  }
}

</mosaic_0001>

<bundles_post_ra>
// kernel: tpu_custom_call.1
= control target key start
LH: loop header
LB: loop body
LE: loop exit
PB: predicated region body
PF: predicated region fallthrough
CT: control target
= control target key end

     0   :  { %12 = vsyncpa [#allocation3], 0  ;;  %s1204_s0 = inlined_call_operand.vmem [shape: bf16[2,4,432], index: 0, kind: input, shape index: {}]   ;;  %s1205_s1 = inlined_call_operand.vmem [shape: bf16[8,36], index: 1, kind: input, shape index: {}]   ;;  %s1206_s2 = inlined_call_operand.vmem [shape: f32[8,1], index: 2, kind: input, shape index: {}]   ;;  %s1207_s3 = inlined_call_operand.vmem [shape: f32[8,2], index: 3, kind: input, shape index: {}]   ;;  %s1208_s4 = inlined_call_operand.vmem [shape: f32[8,2], index: 4, kind: input, shape index: {}]   ;;  %s1209_s5 = inlined_call_operand.vmem [shape: f32[8,1], index: 5, kind: input, shape index: {}]   ;;  %s1210_s6 = inlined_call_operand.vmem [shape: f32[8,1], index: 6, kind: input, shape index: {}]   ;;  %s1211_s7 = inlined_call_operand.hbm [shape: bf16[2,8,384], index: 7, kind: output, shape index: {}]  }
   0x1   :  { %14 = vsyncpa [#allocation3 + $0x1], 0  ;;  %s978_s24 = smov 0   ;;  %s980_s25 = smov 0  }
   0x2   :  { %s982_s26 = smov 0   ;;  %s984_s27 = smov 0  }
   0x3 LB: > { %s999_s28 = sadd.s32 4294967295, %s923_s27   ;;  %s764_s29 = sadd.s32 4294967294, %s923_s27   ;;  %s923_s27 = sphi %s984_s27, %s1217_s27   ;;  %s919_s26 = sphi %s982_s26, %s1216_s26   ;;  %s915_s25 = sphi %s980_s25, %s1215_s25   ;;  %s911_s24 = sphi %s978_s24, %s1214_s24  }
   0x4   : > { %s1003_s30 = sadd.s32 1, %s923_s27   ;;  %s179_s8 = sadd.s32 1, %s919_s26 }
   0x5   : > { %s176_s9 = ssub.s32 %s923_s27, %s1003_s30  ;;  %p189_p0 = scmp.ne.s32.totalorder %s919_s26, %s915_s25 }
   0x6   : > { %p177_p1 = scmp.eq.s32.totalorder %s176_s9, 0  ;;  %p190_p2 = scmp.eq.s32.totalorder %s999_s28, 1 }
   0x7   : > { %p195_p3 = scmp.ne.s32.totalorder %s915_s25, %s911_s24  ;;  %p196_p4 = scmp.eq.s32.totalorder %s764_s29, 1 }
   0x8   : > { %s1014_s10 = scalar_select %p177_p1, %s919_s26, %s179_s8  }
   0x9   : > { %p1016_p5 = por %p190_p2, %p189_p0  ;;  %p1020_p6 = por %p196_p4, %p195_p3 }
   0xa   : > { %p767_p7 = scmp.ge.s32.totalorder %s923_s27, 1  ;;  %p240_p8 = scmp.lt.s32.totalorder %s923_s27, 3 }
   0xc   : > { %p241_p9 = pnand %p767_p7, %p240_p8 }
   0xd   : > { %p272_p10 = scmp.lt.s32.totalorder (!%p241_p9), %s999_s28, 1  ;;  %s926_s18 = smov (!%p241_p9), 90  }
   0xe   : > { %244 = sbr.rel (%p241_p9) target bundleno = 885 (0x375), region = 48  ;;  %s927_s19 = smov (!%p241_p9), 109  }
   0xf   : > { %s928_s20 = smov (!%p241_p9), 108   ;;  %s929_s21 = smov (!%p241_p9), 92  }
  0x10   : > { %s931_s22 = smov (!%p241_p9), 91   ;;  %s932_s23 = smov (!%p241_p9), 127  }
  0x11   : > { %s933_s29 = smov (!%p241_p9), 126   ;;  %s935_s8 = smov (!%p241_p9), 110  }
  0x12   : > { %s803_s9 = smul.u32 (!%p241_p9), 192, %s999_s28 }
  0x13   : > { %v284_v0 = vlaneseq  ;;  %v925_v1 = vmov 1983009808   ;;  %s273_s13 = scalar_select %p272_p10, %s999_s28, 1  ;;  %v930_v16 = vmov 0.0   ;;  %v934_v19 = vmov 0   ;;  %v457_v20 = vld [vmem:[%s1206_s2] sm:$0xff] }
  0x14   : > { %v282_v2 = vunpack.c.l.s4 %v925_v1  ;;  %786 = vmatprep.subr.bf16.mxu1 %v930_v16  ;;  %508 = vmatprep.mubr.bf16.mxu0 %v934_v19  ;;  %vm936_vm0 = vmmov 0   ;;  %vm401_vm1 = vcmask 736256   ;;  %vm405_vm2 = vcmask 1041408   ;;  %s937_s28 = smov [#allocation2]  }
  0x15   : > { %v285_v3 = vshrl.u32 %v284_v0, 7  ;;  %s779_s14 = sshll.u32 %s273_s13, 3  ;;  %855 = vset.pattern.permute.xlu0 %v934_v19  ;;  %856 = vset.pattern.permute.xlu1 %v934_v19  ;;  %vm365_vm3 = vcmask 883712   ;;  %vm377_vm4 = vcmask 752640   ;;  %vm353_vm5 = vcmask 891904  }
  0x16   : > { %v283_v4 = vunpack.c.0.s8 %v282_v2  ;;  %s276_s17 = scalar_lea.vmem %s1204_s0, %s779_s14  ;;  %792 = vmatprep.mubr.msk.bf16.mxu1 %vm936_vm0, %v930_v16  ;;  %vm389_vm6 = vcmask 744448   ;;  %vm415_vm7 = vcmask 1043456   ;;  %vm422_vm8 = vcmask 1045504  }
  0x17   : > { %v278_v6 = vld [vmem:[%s276_s17] sm:$0xff]  ;;  %vm313_vm9 = vcmask 1039360   ;;  %vm327_vm10 = vcmask 1031168   ;;  %vm340_vm11 = vcmask 900096   ;;  %vm463_vm12 = vcmask 293888   ;;  %s1169_s17 = scalar_lea.hbm %s1211_s7, %s803_s9 }
  0x18   : > { %v286_v5 = vsub.s32 %v283_v4, %v285_v3  ;;  %v280_v8 = vcombine.high %v278_v6, %v278_v6  ;;  %v296_v11 = vcombine.low %v278_v6, %v278_v6 }
  0x1a   : > { %v1032_v7 = vrot.slane %v278_v6, %v286_v5  ;;  %v1036_v9 = vrot.slane %v280_v8, %v286_v5  ;;  %v303_v12 = vrot.slane %v296_v11, %v286_v5 }
  0x1c   : > { %393 = vrot.lane.b32.xlu0 %v1032_v7, %s926_s18  ;;  %v1040_v10 = vcombine.high %v1032_v7, %v1032_v7  ;;  %397 = vrot.lane.b32.xlu1 %v1036_v9, %s926_s18  ;;  %v304_v13 = vcombine.high %v303_v12, %v303_v12  ;;  %v318_v14 = vcombine.low %v1036_v9, %v1036_v9 }
  0x1d   : > { %v317_v15 = vcombine.low %v1032_v7, %v1032_v7  ;;  %v331_v17 = vcombine.low %v303_v12, %v303_v12  ;;  %v344_v18 = vcombine.high %v1036_v9, %v1036_v9 }
  0x20   : > { %395 = vrot.lane.b32.xlu0 %v1040_v10, %s926_s18  ;;  %347 = vrot.lane.b32.xlu1 %v1040_v10, %s927_s19 }
  0x24   : > { %349 = vrot.lane.b32.xlu0 %v1036_v9, %s927_s19  ;;  %345 = vrot.lane.b32.xlu1 %v1032_v7, %s927_s19 }
  0x28   : > { %361 = vrot.lane.b32.xlu0 %v1032_v7, %s928_s20  ;;  %359 = vrot.lane.b32.xlu1 %v304_v13, %s928_s20 }
  0x2c   : > { %357 = vrot.lane.b32.xlu0 %v303_v12, %s928_s20  ;;  %371 = vrot.lane.b32.xlu1 %v1032_v7, %s929_s21 }
  0x30   : > { %373 = vrot.lane.b32.xlu0 %v318_v14, %s929_s21  ;;  %369 = vrot.lane.b32.xlu1 %v317_v15, %s929_s21 }
  0x34   : > { %383 = vrot.lane.b32.xlu0 %v303_v12, %s931_s22  ;;  %385 = vrot.lane.b32.xlu1 %v317_v15, %s931_s22 }
  0x38   : > { %381 = vrot.lane.b32.xlu0 %v331_v17, %s931_s22  ;;  %399 = vrot.lane.b32.xlu1 %v344_v18, %s926_s18 }
  0x3c   : > { %307 = vrot.lane.b32.xlu0 %v304_v13, %s932_s23  ;;  %309 = vrot.lane.b32.xlu1 %v1032_v7, %s932_s23 }
  0x40   : > { %305 = vrot.lane.b32.xlu0 %v303_v12, %s932_s23  ;;  %321 = vrot.lane.b32.xlu1 %v1032_v7, %s933_s29 }
  0x44   : > { %323 = vrot.lane.b32.xlu0 %v318_v14, %s933_s29  ;;  %351 = vrot.lane.b32.xlu1 %v344_v18, %s927_s19 }
  0x48   : > { %363 = vrot.lane.b32.xlu0 %v1040_v10, %s928_s20  ;;  %319 = vrot.lane.b32.xlu1 %v317_v15, %s933_s29  ;;  %s867_s20 = sshll.u32 %s937_s28, 4  ;;  %s868_s20 = int_to_ptr.vmem [resolvable:$false] %s867_s20 }
  0x4c   : > { %334 = vrot.lane.b32.xlu0 %v303_v12, %s935_s8  ;;  %336 = vrot.lane.b32.xlu1 %v317_v15, %s935_s8 }
  0x50   : > { %375 = vrot.lane.b32.xlu0 %v1036_v9, %s929_s21  ;;  %332 = vrot.lane.b32.xlu1 %v331_v17, %s935_s8  ;;  %s869_s21 = scalar_lea.vmem %s868_s20, 384 }
  0x54   : > { %387 = vrot.lane.b32.xlu0 %v1032_v7, %s931_s22  ;;  %311 = vrot.lane.b32.xlu1 %v1040_v10, %s932_s23 }
  0x58   : > { %325 = vrot.lane.b32.xlu0 %v1036_v9, %s933_s29  ;;  %338 = vrot.lane.b32.xlu1 %v1032_v7, %s935_s8  ;;  %s269_s29 = sand.u32 1, %s915_s25  }
  0x59   : > { %s796_s8 = smul.u32 12, %s269_s29  ;;  %s691_s18 = scalar_lea.sflag [#allocation3], %s269_s29 }
  0x5b   : > { %s271_s13 = scalar_lea.vmem [#allocation2], %s796_s8 }
  0x5c   : > { %460 = vperm.xlu0 %855, %v457_v20   ;;  %s705_s14 = sshll.u32 %s271_s13, 4  ;;  %s706_s14 = int_to_ptr.vmem [resolvable:$true] %s705_s14 }
  0x5d   : > { %s863_s19 = scalar_lea.vmem %s706_s14, 192  ;;  %p870_p0 = scmp.lt.s32.totalorder %s706_s14, %s868_s20 }
  0x5e   : > { %p864_p11 = scmp.ne.s32.totalorder %s706_s14, %s863_s19  ;;  %p871_p1 = scmp.lt.s32.totalorder %s869_s21, %s863_s19 }
  0x60   : > { %p865_p12 = pnand %p864_p11, %p1016_p5  ;;  %p872_p2 = por %p871_p1, %p870_p0 }
  0x62   : > { %p866_p13 = pneg %p865_p12 }
  0x64   : > { %p873_p3 = pnand %p872_p2, %p866_p13 }
  0x8e   : > { %v394_v21 = vpop.permute.xlu0 %393  ;;  %v398_v22 = vpop.permute.xlu1 %397 }
  0x92   : > { %v396_v23 = vpop.permute.xlu0 %395  ;;  %v348_v26 = vpop.permute.xlu1 %347 }
  0x93   : > { %v403_v24 = vsel %vm401_vm1, %v396_v23, %v398_v22  ;;  %v402_v25 = vsel %vm401_vm1, %v394_v21, %v396_v23 }
  0x94   : > { %770 = vmatprep.subr.msk.bf16.mxu0 %vm405_vm2, %v403_v24  ;;  %v468_v27 = vsel %vm405_vm2, %v402_v25, 0 }
  0x95   : > { %487 = vmatpush1.bf16.msra.mxu0 %v468_v27 }
  0x96   : > { %v1083_v28 = vpop.permute.xlu0 %349  ;;  %v346_v29 = vpop.permute.xlu1 %345 }
  0x97   : > { %v355_v39 = vsel %vm353_vm5, %v348_v26, %v1083_v28  ;;  %v354_v44 = vsel %vm353_vm5, %v346_v29, %v348_v26  ;;  %v456_v26 = vld [vmem:[%s1205_s1] sm:$0xf] }
  0x9a   : > { %v362_v30 = vpop.permute.xlu0 %361  ;;  %v360_v31 = vpop.permute.xlu1 %359 }
  0x9b   : > { %v367_v36 = vsel %vm365_vm3, %v360_v31, %v362_v30 }
  0x9c   : > { %v437_v41 = vsel %vm405_vm2, %v355_v39, %v367_v36 }
  0x9e   : > { %v358_v32 = vpop.permute.xlu0 %357  ;;  %v372_v33 = vpop.permute.xlu1 %371 }
  0x9f   : > { %v366_v40 = vsel %vm365_vm3, %v358_v32, %v360_v31 }
  0xa0   : > { %v434_v47 = vsel %vm405_vm2, %v354_v44, %v366_v40 }
  0xa2   : > { %v374_v34 = vpop.permute.xlu0 %373  ;;  %v370_v35 = vpop.permute.xlu1 %369 }
  0xa3   : > { %v379_v37 = vsel %vm377_vm4, %v372_v33, %v374_v34  ;;  %v378_v42 = vsel %vm377_vm4, %v370_v35, %v372_v33 }
  0xa4   : > { %v444_v46 = vsel %vm415_vm7, %v437_v41, %v379_v37  ;;  %v442_v51 = vsel %vm415_vm7, %v434_v47, %v378_v42  ;;  %v560_v37 = vand.u32 127, %v284_v0 }
  0xa6   : > { %v384_v38 = vpop.permute.xlu0 %383  ;;  %v386_v43 = vpop.permute.xlu1 %385  ;;  %v562_v39 = vadd.s32 256, %v560_v37 }
  0xa7   : > { %v391_v45 = vsel %vm389_vm6, %v384_v38, %v386_v43 }
  0xa8   : > { %v451_v49 = vsel %vm422_vm8, %v444_v46, %v391_v45 }
  0xa9   : > { %488 = vmatprep.subr.bf16.mxu0 %v451_v49 }
  0xaa   : > { %v382_v48 = vpop.permute.xlu0 %381  ;;  %v400_v52 = vpop.permute.xlu1 %399 }
  0xab   : > { %v390_v50 = vsel %vm389_vm6, %v382_v48, %v384_v38  ;;  %v404_v54 = vsel %vm401_vm1, %v398_v22, %v400_v52  ;;  %v561_v38 = vadd.s32 128, %v560_v37 }
  0xac   : > { %v448_v53 = vsel %vm422_vm8, %v442_v51, %v390_v50  ;;  %v474_v56 = vsel %vm405_vm2, %v404_v54, 0 }
  0xad   : > { %489 = vmatpush1.bf16.msra.mxu0 %v448_v53  ;;  %787 = vmatpush3.bf16.msra.mxu1 %v474_v56  ;;  %v1140_v41 = vmul.u32.u64.low 3817748708, %v561_v38  ;;  %v1141_v42 = vmul.u32.u64.high 3817748708, %v561_v38, %v1140_v41 }
  0xae   : > { %v308_v55 = vpop.permute.xlu0 %307  ;;  %v310_v57 = vpop.permute.xlu1 %309  ;;  %788 = vmatprep.subr.bf16.mxu1 %v930_v16 }
  0xaf   : > { %v315_v1 = vsel %vm313_vm9, %v308_v55, %v310_v57  ;;  %v580_v46 = vshrl.u32 %v1141_v42, 4 }
  0xb0   : > { %v411_v4 = vsel %vm405_vm2, %v1040_v10, %v315_v1 }
  0xb1   : > { %v581_v49 = vmul.u32 18, %v580_v46 }
  0xb2   : > { %v306_v58 = vpop.permute.xlu0 %305  ;;  %v322_v59 = vpop.permute.xlu1 %321 }
  0xb3   : > { %v314_v6 = vsel %vm313_vm9, %v306_v58, %v308_v55  ;;  %v582_v51 = vsub.s32 %v561_v38, %v581_v49 }
  0xb4   : > { %v408_v17 = vsel %vm405_vm2, %v1032_v7, %v314_v6 }
  0xb5   : > { %vm597_vm15 = vcmp.ne.s32.totalorder %v582_v51, 0  ;;  %vm600_vm0 = vcmp.lt.s32.totalorder %v582_v51, 0  ;;  %v606_v54 = vadd.s32 18, %v582_v51 }
  0xb6   : > { %v324_v60 = vpop.permute.xlu0 %323  ;;  %v352_v61 = vpop.permute.xlu1 %351 }
  0xb7   : > { %v329_v2 = vsel %vm327_vm10, %v322_v59, %v324_v60  ;;  %v356_v19 = vsel %vm353_vm5, %v1083_v28, %v352_v61 }
  0xb8   : > { %v419_v11 = vsel %vm415_vm7, %v411_v4, %v329_v2 }
  0xba   : > { %v364_v62 = vpop.permute.xlu0 %363  ;;  %v320_v63 = vpop.permute.xlu1 %319 }
  0xbb   : > { %v328_v12 = vsel %vm327_vm10, %v320_v63, %v322_v59  ;;  %v368_v15 = vsel %vm365_vm3, %v362_v30, %v364_v62 }
  0xbc   : > { %v417_v21 = vsel %vm415_vm7, %v408_v17, %v328_v12  ;;  %v440_v22 = vsel %vm405_vm2, %v356_v19, %v368_v15  ;;  %v630_v19 = vld [vmem:[%s1207_s3] sm:$0xff] }
  0xbe   : > { %v335_v3 = vpop.permute.xlu0 %334  ;;  %v337_v5 = vpop.permute.xlu1 %336 }
  0xbf   : > { %v342_v8 = vsel %vm340_vm11, %v335_v3, %v337_v5 }
  0xc0   : > { %v427_v14 = vsel %vm422_vm8, %v419_v11, %v342_v8 }
  0xc1   : > { %490 = vmatprep.subr.bf16.mxu0 %v427_v14 }
  0xc2   : > { %v376_v13 = vpop.permute.xlu0 %375  ;;  %v333_v18 = vpop.permute.xlu1 %332 }
  0xc3   : > { %v380_v10 = vsel %vm377_vm4, %v374_v34, %v376_v13  ;;  %v341_v20 = vsel %vm340_vm11, %v333_v18, %v335_v3  ;;  %vm603_vm4 = vmand %vm600_vm0, %vm597_vm15 }
  0xc4   : > { %v424_v24 = vsel %vm422_vm8, %v417_v21, %v341_v20  ;;  %v446_v7 = vsel %vm415_vm7, %v440_v22, %v380_v10 }
  0xc5   : > { %491 = vmatpush1.bf16.msra.mxu0 %v424_v24 }
  0xc6   : > { %v388_v23 = vpop.permute.xlu0 %387  ;;  %v312_v27 = vpop.permute.xlu1 %311 }
  0xc7   : > { %v392_v25 = vsel %vm389_vm6, %v386_v43, %v388_v23  ;;  %v316_v29 = vsel %vm313_vm9, %v310_v57, %v312_v27  ;;  %v1143_v43 = vmul.u32.u64.low 3817748708, %v562_v39  ;;  %v1144_v44 = vmul.u32.u64.high 3817748708, %v562_v39, %v1143_v43  ;;  %v641_v27 = vld [vmem:[%s1208_s4] sm:$0xff] }
  0xc8   : > { %v454_v28 = vsel %vm422_vm8, %v446_v7, %v392_v25  ;;  %v414_v30 = vsel %vm405_vm2, %v1036_v9, %v316_v29  ;;  %771 = vmatmul.mubr.msk.bf16.vlgmr.msra.gmra.mxu0 %vm463_vm12, %v456_v26  ;;  %v1137_v9 = vmul.u32.u64.low 3817748708, %v560_v37  ;;  %v1138_v40 = vmul.u32.u64.high 3817748708, %v560_v37, %v1137_v9 }
  0xc9   : > { %789 = vmatpush3.bf16.msra.mxu1 %v454_v28  ;;  %v591_v47 = vshrl.u32 %v1144_v44, 4  ;;  %v609_v57 = vsel %vm603_vm4, %v606_v54, %v582_v51  ;;  %vm616_vm9 = vcmp.lt.s32.totalorder %v562_v39, 288 }
  0xca   : > { %v326_v31 = vpop.permute.xlu0 %325  ;;  %790 = vmatprep.subr.bf16.mxu1 %v930_v16  ;;  %v339_v33 = vpop.permute.xlu1 %338  ;;  %v569_v45 = vshrl.u32 %v1138_v40, 4 }
  0xcb   : > { %v330_v32 = vsel %vm327_vm10, %v324_v60, %v326_v31  ;;  %v343_v35 = vsel %vm340_vm11, %v337_v5, %v339_v33  ;;  %v592_v0 = vmul.u32 18, %v591_v47  ;;  %vm632_vm11 = vcmask 15360   ;;  %v558_v31 = vld [vmem:[%s1210_s6] sm:$0xff] }
  0xcc   : > { %v421_v34 = vsel %vm415_vm7, %v414_v30, %v330_v32  ;;  %v570_v48 = vmul.u32 18, %v569_v45  ;;  %vm612_vm7 = vcmp.lt.s32.totalorder %v609_v57, 16 }
  0xcd   : > { %v430_v36 = vsel %vm422_vm8, %v421_v34, %v343_v35  ;;  %v593_v52 = vsub.s32 %v562_v39, %v592_v0  ;;  %v621_v3 = vsel %vm612_vm7, 0.00390625, %v930_v16 }
  0xce   : > { %791 = vmatpush3.bf16.msra.mxu1 %v430_v36  ;;  %v571_v50 = vsub.s32 %v560_v37, %v570_v48  ;;  %v557_v36 = vld [vmem:[%s1209_s5] sm:$0xff] }
  0xcf   : > { %vm598_vm1 = vcmp.ne.s32.totalorder %v593_v52, 0  ;;  %vm601_vm2 = vcmp.lt.s32.totalorder %v593_v52, 0  ;;  %v607_v55 = vadd.s32 18, %v593_v52 }
  0xd0   : > { %vm596_vm13 = vcmp.ne.s32.totalorder %v571_v50, 0  ;;  %vm599_vm14 = vcmp.lt.s32.totalorder %v571_v50, 0  ;;  %v605_v53 = vadd.s32 18, %v571_v50  ;;  %vm604_vm5 = vmand %vm601_vm2, %vm598_vm1 }
  0xd1   : > { %793 = vmatmul.mubr.msk.bf16.vlgmr.msra.gmra.mxu1 %vm463_vm12, %v456_v26  ;;  %vm602_vm3 = vmand %vm599_vm14, %vm596_vm13  ;;  %v610_v58 = vsel %vm604_vm5, %v607_v55, %v593_v52 }
  0xd2   : > { %v608_v56 = vsel %vm602_vm3, %v605_v53, %v571_v50  ;;  %vm613_vm8 = vcmp.lt.s32.totalorder %v610_v58, 16 }
  0xd3   : > { %vm611_vm6 = vcmp.lt.s32.totalorder %v608_v56, 16  ;;  %vm619_vm10 = vmand %vm613_vm8, %vm616_vm9 }
  0xd4   : > { %v620_v2 = vsel %vm611_vm6, 0.00390625, %v930_v16  ;;  %v622_v11 = vsel %vm619_vm10, 0.00390625, %v930_v16 }
  0xd7   : > { %v461_v60 = vpop.permute.xlu0 %460 }
 0x188   : > { %v510_v59 = vpop.f32.mrf.mxu0 }
 0x189   : > { %v511_v62 = vadd.f32 %v510_v59, %v461_v60 }
 0x18a   : > { %v512_v61 = vpop.f32.mrf.mxu0 }
 0x18b   : > { %v513_v63 = vadd.f32 %v512_v61, %v461_v60  ;;  %v623_v5 = vmul.f32 %v620_v2, %v511_v62 }
 0x18c   : > { %v514_v1 = vpop.f32.mrf.mxu0 }
 0x18d   : > { %v624_v6 = vmul.f32 %v621_v3, %v513_v63 }
 0x18e   : > { %v515_v4 = vpop.f32.mrf.mxu0 }
 0x18f   : > { %v626_v15 = vadd.f32 %v624_v6, %v623_v5 }
 0x191   : > { %v551_v8 = vpop.f32.mrf.mxu1 }
 0x192   : > { %v552_v12 = vadd.f32 %v551_v8, %v461_v60 }
 0x193   : > { %v794_v13 = vpop.f32.mrf.mxu1 }
 0x194   : > { %v625_v14 = vmul.f32 %v622_v11, %v552_v12 }
 0x195   : > { %v554_v17 = vpop.f32.mrf.mxu1 }
 0x196   : > { %v627_v10 = vadd.f32 %v626_v15, %v625_v14 }
 0x197   : > { %v795_v18 = vpop.f32.mrf.mxu1 }
 0x198   : > { %628 = vadd.xlane.f32.xlu1 %v627_v10 }
 0x221   : > { %v629_v20 = vpop.xlane.xlu1 %628 }
 0x222   : > { %v631_v21 = vmul.f32 %v630_v19, %v629_v20 }
 0x224   : > { %v633_v22 = vsel %vm632_vm11, %v631_v21, 0.0 }
 0x225   : > { %v634_v23 = vrot.slane %v633_v22, 4 }
 0x227   : > { %v635_v24 = vadd.f32 %v634_v23, %v633_v22 }
 0x229   : > { %v636_v25 = vrot.slane %v635_v24, 2 }
 0x22b   : > { %v637_v16 = vadd.f32 %v636_v25, %v635_v24 }
 0x22d   : > { %v638_v7 = vrot.slane %v637_v16, 1 }
 0x22f   : > { %v639_v26 = vadd.f32 %v638_v7, %v637_v16 }
 0x231   : > { %v640_v28 = vmax.f32 %v639_v26, 0.0 }
 0x233   : > { %v642_v29 = vmul.f32 %v641_v27, %v640_v28 }
 0x235   : > { %v643_v30 = vsel %vm632_vm11, %v642_v29, 0.0 }
 0x236   : > { %644 = vadd.xlane.f32.xlu0 %v643_v30 }
 0x24c   : > { %663 = vperm.xlu0 %855, %v558_v31  }
 0x2bf   : > { %v645_v32 = vpop.xlane.xlu0 %644 }
 0x2c0   : > { %v773_v33 = vmul.f32 -1.442695, %v645_v32 }
 0x2c2   : > { %859 = vpow2.f32 %v773_v33 }
 0x2c7   : > { %v664_v42 = vpop.permute.xlu0 %663 }
 0x2cf   : > { %v860_v34 = vpop.eup %859 }
 0x2d0   : > { %v649_v35 = vadd.f32 1.0, %v860_v34 }
 0x2d2   : > { %861 = vrcp.f32 %v649_v35 }
 0x2df   : > { %v862_v37 = vpop.eup %861 }
 0x2e0   : > { %v652_v38 = vmul.f32 %v862_v37, %v557_v36 }
 0x2e2   : > { %655 = vperm.xlu1 %856, %v652_v38  }
 0x35d   : > { %v656_v39 = vpop.permute.xlu1 %655 }
 0x35e   : > { %v658_v9 = vmul.f32 %v656_v39, %v511_v62  ;;  %v659_v40 = vmul.f32 %v656_v39, %v513_v63  ;;  %v660_v41 = vmul.f32 %v656_v39, %v552_v12 }
 0x360   : > { %v666_v43 = vadd.f32 %v664_v42, %v658_v9  ;;  %v667_v44 = vadd.f32 %v664_v42, %v659_v40  ;;  %v668_v45 = vadd.f32 %v664_v42, %v660_v41 }
 0x362   : > { %v669_v46 = vmax.f32 %v666_v43, 0.0  ;;  %v670_v47 = vmax.f32 %v667_v44, 0.0  ;;  %v671_v48 = vmax.f32 %v668_v45, 0.0 }
 0x364   : > { %v672_v49 = vmin.f32 %v669_v46, 6.0  ;;  %v673_v0 = vmin.f32 %v670_v47, 6.0  ;;  %v674_v50 = vmin.f32 %v671_v48, 6.0 }
 0x366   : > { %v780_v51 = vpack.c.bf16 %v673_v0, %v672_v49  ;;  %v781_v52 = vpack.c.bf16 %v674_v50, %v674_v50 }
 0x368   : > { %688 = vst [vmem:[%s271_s13] sm:$0xff] %v780_v51  ;;  %689 = vst [vmem:[%s271_s13 + $0x8] sm:$0xf] %v781_v52 }
 0x369   : > { %876 = shalt.err (!%p873_p3)
}
 0x36a   : > { %s877_s22 = scalar_lea.hbm %s1169_s17, 192  ;;  %s881_s8 = scalar_lea.hbm %s1211_s7, 384 }
 0x36b   : > { %p878_p4 = scmp.ne.s32.totalorder %s1169_s17, %s877_s22  ;;  %p882_p9 = scmp.lt.s32.totalorder %s1169_s17, %s1211_s7 }
 0x36c   : > { %p883_p10 = scmp.lt.s32.totalorder %s881_s8, %s877_s22 }
 0x36d   : > { %p879_p7 = pnand %p878_p4, %p1016_p5 }
 0x36e   : > { %p884_p11 = por %p883_p10, %p882_p9 }
 0x36f   : > { %p880_p8 = pneg %p879_p7 }
 0x371   : > { %p885_p12 = pnand %p884_p11, %p880_p8 }
 0x373   : > { %888 = shalt.err (!%p885_p12)
}
 0x374   : > { %804 = dma.vmem_to_hbm [thread:$0]  (%p1016_p5), %s706_s14, 192, %s1169_s17, %s691_s18  }
 0x375 PF: > { %p810_p13 = scmp.ge.s32.totalorder %s923_s27, 2  ;;  %s717_s15 = sand.u32 1, %s911_s24  }
 0x376   : > { %s718_s16 = scalar_lea.sflag [#allocation3], %s717_s15 }
 0x377   : > { %p807_p0 = pnand %p810_p13, %p1020_p6 }
 0x379   : > { %p808_p1 = pneg %p807_p0 }
 0x37b   : > { %906 = dma.done.wait (%p808_p1), %s718_s16, 192  }
 0x37c   : > { %908 = vsyncadd (%p808_p1), %s718_s16, 4294967104  ;;  %p17_p2 = scmp.ge.s32.totalorder %s1003_s30, 4   ;;  %s1214_s24 = smov %s915_s25 }
 0x37d   : > { %s1215_s25 = smov %s919_s26  ;;  %s1216_s26 = smov %s1014_s10 }
 0x37e   : > { %s1217_s27 = smov %s1003_s30  ;;  %19 = sbr.rel (!%p17_p2) target bundleno = 3 (0x3), region = 83 }
 0x383   :  { %723 = vsyncpa [#allocation3], 1 }
 0x384   :  { %725 = vsyncpa [#allocation3 + $0x1], 1 }

</bundles_post_ra>
